<compile_context>
chip_gen: v5e
topology: v5e:2x2
jax: 0.10.0
libtpu: 0.0.40
codegen_flags: <defaults>
</compile_context>

<pallas_src>
import functools

import jax
import jax.numpy as jnp
from jax import lax
from jax.experimental import pallas as pl
from jax.experimental.pallas import tpu as pltpu


def _round_up(a, m):
    return -(-a // m) * m


def _mlp_kernel(*refs, relu_flags, matmul_dtype):
    """Fused MLP kernel.

    refs = (x_ref,
            W0, b0, W1, b1, ..., W_{L-1}, b_{L-1},   # (folded) hidden stack
            W_out_row, b_out,                         # head (W pre-transposed to (1, h_last))
            o_ref)                                    # (1, 1, tm) lane-dense output block
    """
    x_ref = refs[0]
    o_ref = refs[-1]
    param_refs = refs[1:-1]

    h = x_ref[...]  # (tm, D) f32

    # Hidden linear stack.  After the wrapper-side fold of layers 0 and 1,
    # every layer in this stack is Linear -> ReLU (Dropout = identity in eval
    # mode).  For a single-hidden-layer model (no fold) relu_flags == (False,).
    for li, apply_relu in enumerate(relu_flags):
        w = param_refs[2 * li][...].astype(matmul_dtype)    # (in, out)
        b = param_refs[2 * li + 1][...]                     # (1, out) f32
        h = jnp.dot(h.astype(matmul_dtype), w,
                    preferred_element_type=jnp.float32) + b
        if apply_relu:
            h = jnp.maximum(h, 0.0)

    # Output head: Linear(h_last, 1) -> Tanh, computed lane-dense:
    #   y[0, m] = sum_k w_row[0, k] * h[m, k]   -> (1, tm)
    # RHS contracted on its last dim (q @ k.T pattern) -> MXU consumes it
    # without materializing h^T; LHS has a single row so this pass is tiny.
    w_row = param_refs[-2][...].astype(matmul_dtype)        # (1, h_last)
    b_out = param_refs[-1][...]                             # (1, 1) f32
    y = lax.dot_general(
        w_row, h.astype(matmul_dtype),
        dimension_numbers=(((1,), (1,)), ((), ())),
        preferred_element_type=jnp.float32)                 # (1, tm) f32
    y = jnp.tanh(y + b_out)                                 # b_out broadcasts over lanes

    tm = o_ref.shape[-1]
    o_ref[...] = y.reshape(1, 1, tm).astype(o_ref.dtype)


def init_dnn_params(key, input_dim, hidden_dim):
    """PyTorch-style (uniform +/-1/sqrt(fan_in)) Linear init.

    Returns [W0, b0, W1, b1, ..., W_out, b_out] with W: (fan_in, fan_out) and
    b: (1, fan_out), all float32.
    """
    dims = [input_dim] + list(hidden_dim)
    params = []
    for i in range(1, len(dims)):
        fan_in, fan_out = dims[i - 1], dims[i]
        key, kw, kb = jax.random.split(key, 3)
        bound = 1.0 / jnp.sqrt(float(fan_in))
        w = jax.random.uniform(kw, (fan_in, fan_out), jnp.float32, -bound, bound)
        b = jax.random.uniform(kb, (1, fan_out), jnp.float32, -bound, bound)
        params += [w, b]
    fan_in = dims[-1]
    key, kw, kb = jax.random.split(key, 3)
    bound = 1.0 / jnp.sqrt(float(fan_in))
    w = jax.random.uniform(kw, (fan_in, 1), jnp.float32, -bound, bound)
    b = jax.random.uniform(kb, (1, 1), jnp.float32, -bound, bound)
    params += [w, b]
    return params


def _choose_row_tile(rows, tm):
    """Pick the row tile: multiple of 128, low padding waste, >= 2 tiles when possible."""
    rows_128 = _round_up(rows, 128)
    tm = max(128, min((int(tm) // 128) * 128, rows_128))
    # Padded rows run the full MLP: keep waste under ~20% of real rows.
    while tm > 128 and (_round_up(rows, tm) - rows) * 5 > rows:
        tm -= 128
    # v7x has 2 TensorCores: the "parallel" grid axis only shards across them
    # if there are >= 2 grid steps, so split a single full tile in two.
    if rows_128 >= 256 and pl.cdiv(rows, tm) < 2:
        tm = max(128, _round_up(pl.cdiv(rows_128, 2), 128))
    return tm


def dnn_forward(x, params, num_hidden_layers, *, tm=2048,
                matmul_dtype=jnp.bfloat16):
    """x: (B, N, input_dim) f32 -> (B, N) f32  (mirrors DNN.forward in eval mode)."""
    B, N, D = x.shape
    rows = B * N

    # Fold Linear0 and Linear1: the PyTorch module applies NO activation
    # between them (ReLU/Dropout only follow the Linears added for i >= 1),
    # so (x@W0+b0)@W1 + b1 == x@(W0@W1) + (b0@W1 + b1).  One fewer matmul
    # pass over every row; the fold itself is a tiny one-time f32 host matmul.
    hidden_params = list(params[:2 * num_hidden_layers])
    if num_hidden_layers >= 2:
        w0, b0, w1, b1 = hidden_params[:4]
        hidden_params = [w0 @ w1, b0 @ w1 + b1] + hidden_params[4:]
        relu_flags = (True,) * (num_hidden_layers - 1)
    else:
        relu_flags = (False,) * num_hidden_layers

    # Head weight pre-transposed (free, tiny) so the kernel emits a lane-dense
    # (1, tm) result with full unmasked stores.
    w_out_row = params[-2].T          # (1, h_last)
    b_out = params[-1]                # (1, 1)

    tm = _choose_row_tile(rows, tm)
    num_tiles = pl.cdiv(rows, tm)
    rows_padded = num_tiles * tm

    # No wrapper-side jnp.pad (extra HBM round-trip): the last partial x block
    # is handled by Pallas.  The garbage rows it computes are per-row only and
    # are sliced off below — they never mix with valid rows.
    x2d = x.reshape(rows, D)

    # x: tiled along rows.  Weights/biases: explicit full-array blocks with a
    # constant block index -> DMA'd once, held VMEM-resident across the grid.
    in_specs = [pl.BlockSpec((tm, D), lambda i: (i, 0))]
    for p in hidden_params:
        in_specs.append(pl.BlockSpec(p.shape, lambda i: (0, 0)))
    in_specs.append(pl.BlockSpec(w_out_row.shape, lambda i: (0, 0)))
    in_specs.append(pl.BlockSpec(b_out.shape, lambda i: (0, 0)))

    # Lane-dense output: one (1, tm) row per grid step in a (num_tiles, 1, tm) slab.
    out_spec = pl.BlockSpec((1, 1, tm), lambda i: (i, 0, 0))

    # Advisory cost estimate for XLA's scheduler around the custom call.
    flops = 0
    for w in hidden_params[0::2]:
        flops += 2 * rows_padded * int(w.shape[0]) * int(w.shape[1])
    flops += 2 * rows_padded * int(w_out_row.shape[1])
    param_bytes = sum(int(p.size) * 4 for p in hidden_params) \
        + int(w_out_row.size) * 4 + 4
    cost = pl.CostEstimate(
        flops=int(flops),
        transcendentals=int(rows_padded),          # tanh
        bytes_accessed=int(rows * D * 4 + rows_padded * 4 + param_bytes),
    )

    kernel = functools.partial(
        _mlp_kernel, relu_flags=relu_flags, matmul_dtype=matmul_dtype)

    out3d = pl.pallas_call(
        kernel,
        out_shape=jax.ShapeDtypeStruct((num_tiles, 1, tm), jnp.float32),
        grid_spec=pltpu.PrefetchScalarGridSpec(
            num_scalar_prefetch=0,
            grid=(num_tiles,),
            in_specs=in_specs,
            out_specs=out_spec,
        ),
        compiler_params=pltpu.CompilerParams(
            dimension_semantics=("parallel",),
        ),
        cost_estimate=cost,
    )(x2d, *hidden_params, w_out_row, b_out)

    # (num_tiles, 1, tm) -> (rows_padded,) -> drop padded rows -> (B, N)
    # (matches nn.Flatten(-2, -1) applied to the (B, N, 1) per-row scalars).
    return out3d.reshape(rows_padded)[:rows].reshape(B, N)


def dnn_reference(x, params, num_hidden_layers):
    """Pure-JAX f32 reference with the exact PyTorch layer semantics."""
    B, N, D = x.shape
    h = x.reshape(B * N, D)
    for li in range(num_hidden_layers):
        w, b = params[2 * li], params[2 * li + 1]
        h = h @ w + b
        if li >= 1:                       # ReLU only after the i>=1 Linears
            h = jnp.maximum(h, 0.0)
    w_out, b_out = params[-2], params[-1]
    y = jnp.tanh(h @ w_out + b_out)
    return y.reshape(B, N)


if __name__ == "__main__":
    key = jax.random.PRNGKey(0)
    input_dim = 16

    # --- Case 1: small shapes, 2 hidden layers (single padded tile) ---
    B, N = 2, 8
    hidden_dim = [32, 32]          # Linear(16,32); Linear(32,32)+ReLU+Dropout(0.1)
    key, kx, kp = jax.random.split(key, 3)
    x = jax.random.normal(kx, (B, N, input_dim), jnp.float32)
    params = init_dnn_params(kp, input_dim, hidden_dim)
    ref = dnn_reference(x, params, num_hidden_layers=len(hidden_dim))

    out = jax.block_until_ready(
        dnn_forward(x, params, num_hidden_layers=len(hidden_dim)))        # bf16 MXU path
    assert out.shape == (B, N), out.shape
    assert jnp.allclose(out, ref, atol=6e-2, rtol=0.0), "bf16 mismatch (case 1)"

    out_f32 = jax.block_until_ready(
        dnn_forward(x, params, num_hidden_layers=len(hidden_dim),
                    matmul_dtype=jnp.float32))                            # exact structure check
    assert jnp.allclose(out_f32, ref, atol=1e-5, rtol=1e-5), "f32 mismatch (case 1)"

    # --- Case 2: multi-tile grid + ragged partial last block (rows = 600) ---
    B2, N2 = 5, 120
    key, kx2 = jax.random.split(key)
    x2 = jax.random.normal(kx2, (B2, N2, input_dim), jnp.float32)
    ref2 = dnn_reference(x2, params, num_hidden_layers=len(hidden_dim))

    out2 = jax.block_until_ready(
        dnn_forward(x2, params, num_hidden_layers=len(hidden_dim)))
    assert out2.shape == (B2, N2), out2.shape
    assert jnp.allclose(out2, ref2, atol=6e-2, rtol=0.0), "bf16 mismatch (case 2)"

    out2_f32 = jax.block_until_ready(
        dnn_forward(x2, params, num_hidden_layers=len(hidden_dim),
                    matmul_dtype=jnp.float32))
    assert jnp.allclose(out2_f32, ref2, atol=1e-5, rtol=1e-5), "f32 mismatch (case 2)"

    # --- Case 3: 3 hidden layers (exercises fold + an extra ReLU'd layer) ---
    hidden_dim3 = [24, 48, 32]
    key, kx3, kp3 = jax.random.split(key, 3)
    x3 = jax.random.normal(kx3, (3, 40, input_dim), jnp.float32)
    params3 = init_dnn_params(kp3, input_dim, hidden_dim3)
    ref3 = dnn_reference(x3, params3, num_hidden_layers=len(hidden_dim3))

    out3_f32 = jax.block_until_ready(
        dnn_forward(x3, params3, num_hidden_layers=len(hidden_dim3),
                    matmul_dtype=jnp.float32))
    assert out3_f32.shape == (3, 40), out3_f32.shape
    assert jnp.allclose(out3_f32, ref3, atol=1e-5, rtol=1e-5), "f32 mismatch (case 3)"

    out3_bf16 = jax.block_until_ready(
        dnn_forward(x3, params3, num_hidden_layers=len(hidden_dim3)))
    assert jnp.allclose(out3_bf16, ref3, atol=6e-2, rtol=0.0), "bf16 mismatch (case 3)"

    print("KERNEL_OK")
</pallas_src>

<mosaic_0001>
module attributes {stable_mosaic.version = 11 : i64} {
  func.func @_mlp_kernel(%arg0: i32, %arg1: memref<128x16xf32, #tpu.memory_space<vmem>>, %arg2: memref<16x32xf32, #tpu.memory_space<vmem>>, %arg3: memref<1x32xf32, #tpu.memory_space<vmem>>, %arg4: memref<1x32xf32, #tpu.memory_space<vmem>>, %arg5: memref<1x1xf32, #tpu.memory_space<vmem>>, %arg6: memref<1x1x128xf32, #tpu.memory_space<vmem>>) attributes {dimension_semantics = [#tpu.dimension_semantics<parallel>], iteration_bounds = array<i64: 1>, scalar_prefetch = 0 : i64, scratch_operands = 0 : i64, tpu.core_type = #tpu.core_type<tc>, window_params = [{transform_indices = @transform_0, window_bounds = array<i64: 128, 16>}, {pipeline_mode = #tpu.pipeline_mode<synchronous>, transform_indices = @transform_1, window_bounds = array<i64: 16, 32>}, {pipeline_mode = #tpu.pipeline_mode<synchronous>, transform_indices = @transform_2, window_bounds = array<i64: 1, 32>}, {pipeline_mode = #tpu.pipeline_mode<synchronous>, transform_indices = @transform_3, window_bounds = array<i64: 1, 32>}, {pipeline_mode = #tpu.pipeline_mode<synchronous>, transform_indices = @transform_4, window_bounds = array<i64: 1, 1>}, {transform_indices = @transform_5, window_bounds = array<i64: 1, 1, 128>}]} {
    %c0 = arith.constant 0 : index
    %c0_0 = arith.constant 0 : index
    %0 = vector.load %arg1[%c0, %c0_0] : memref<128x16xf32, #tpu.memory_space<vmem>>, vector<128x16xf32>
    %c0_1 = arith.constant 0 : index
    %c0_2 = arith.constant 0 : index
    %1 = vector.load %arg2[%c0_1, %c0_2] : memref<16x32xf32, #tpu.memory_space<vmem>>, vector<16x32xf32>
    %2 = arith.truncf %1 : vector<16x32xf32> to vector<16x32xbf16>
    %c0_3 = arith.constant 0 : index
    %c0_4 = arith.constant 0 : index
    %3 = vector.load %arg3[%c0_3, %c0_4] : memref<1x32xf32, #tpu.memory_space<vmem>>, vector<1x32xf32>
    %4 = arith.truncf %0 : vector<128x16xf32> to vector<128x16xbf16>
    %cst = arith.constant dense<0.000000e+00> : vector<128x32xf32>
    %5 = tpu.matmul %4, %2, %cst {dimension_numbers = #tpu.dot_dimension_numbers<[1], [0], [0], [1], [0, 0, 1, 1], [], []>} : vector<128x16xbf16>, vector<16x32xbf16>, vector<128x32xf32> -> vector<128x32xf32>
    %6 = vector.broadcast %3 : vector<1x32xf32> to vector<128x32xf32>
    %7 = arith.addf %5, %6 : vector<128x32xf32>
    %cst_5 = arith.constant 0.000000e+00 : f32
    %8 = vector.broadcast %cst_5 : f32 to vector<128x32xf32>
    %9 = arith.maximumf %7, %8 : vector<128x32xf32>
    %c0_6 = arith.constant 0 : index
    %c0_7 = arith.constant 0 : index
    %10 = vector.load %arg4[%c0_6, %c0_7] : memref<1x32xf32, #tpu.memory_space<vmem>>, vector<1x32xf32>
    %11 = arith.truncf %10 : vector<1x32xf32> to vector<1x32xbf16>
    %c0_8 = arith.constant 0 : index
    %c0_9 = arith.constant 0 : index
    %12 = vector.load %arg5[%c0_8, %c0_9] : memref<1x1xf32, #tpu.memory_space<vmem>>, vector<1x1xf32>
    %13 = arith.truncf %9 : vector<128x32xf32> to vector<128x32xbf16>
    %cst_10 = arith.constant dense<0.000000e+00> : vector<1x128xf32>
    %14 = tpu.matmul %11, %13, %cst_10 {dimension_numbers = #tpu.dot_dimension_numbers<[1], [1], [0], [0], [0, 0, 1, 0], [], []>} : vector<1x32xbf16>, vector<128x32xbf16>, vector<1x128xf32> -> vector<1x128xf32>
    %15 = vector.broadcast %12 : vector<1x1xf32> to vector<1x128xf32>
    %16 = arith.addf %14, %15 : vector<1x128xf32>
    %17 = math.tanh %16 : vector<1x128xf32>
    %18 = vector.shape_cast %17 : vector<1x128xf32> to vector<1x1x128xf32>
    %c0_11 = arith.constant 0 : index
    %c0_12 = arith.constant 0 : index
    %c0_13 = arith.constant 0 : index
    %19 = vector.load %arg6[%c0_11, %c0_12, %c0_13] : memref<1x1x128xf32, #tpu.memory_space<vmem>>, vector<1x1x128xf32>
    tpu.vector_store %arg6[%c0_11, %c0_12, %c0_13], %18 {strides = array<i32>} : memref<1x1x128xf32, #tpu.memory_space<vmem>>, vector<1x1x128xf32>,
    return
  }
  func.func @transform_0(%arg0: i32) -> (i32, i32) {
    %c0_i32 = arith.constant 0 : i32
    %c0_i32_0 = arith.constant 0 : i32
    return %arg0, %c0_i32 : i32, i32
  }
  func.func @transform_1(%arg0: i32) -> (i32, i32) {
    %c0_i32 = arith.constant 0 : i32
    %c0_i32_0 = arith.constant 0 : i32
    %c0_i32_1 = arith.constant 0 : i32
    return %c0_i32, %c0_i32_0 : i32, i32
  }
  func.func @transform_2(%arg0: i32) -> (i32, i32) {
    %c0_i32 = arith.constant 0 : i32
    %c0_i32_0 = arith.constant 0 : i32
    %c0_i32_1 = arith.constant 0 : i32
    return %c0_i32, %c0_i32_0 : i32, i32
  }
  func.func @transform_3(%arg0: i32) -> (i32, i32) {
    %c0_i32 = arith.constant 0 : i32
    %c0_i32_0 = arith.constant 0 : i32
    %c0_i32_1 = arith.constant 0 : i32
    return %c0_i32, %c0_i32_0 : i32, i32
  }
  func.func @transform_4(%arg0: i32) -> (i32, i32) {
    %c0_i32 = arith.constant 0 : i32
    %c0_i32_0 = arith.constant 0 : i32
    %c0_i32_1 = arith.constant 0 : i32
    return %c0_i32, %c0_i32_0 : i32, i32
  }
  func.func @transform_5(%arg0: i32) -> (i32, i32, i32) {
    %c0_i32 = arith.constant 0 : i32
    %c0_i32_0 = arith.constant 0 : i32
    %c0_i32_1 = arith.constant 0 : i32
    return %arg0, %c0_i32, %c0_i32_0 : i32, i32, i32
  }
}

</mosaic_0001>

<bundles_post_ra>
// kernel: tpu_custom_call.1
= control target key start
LH: loop header
LB: loop body
LE: loop exit
PB: predicated region body
PF: predicated region fallthrough
CT: control target
= control target key end

     0   :  { %s445_s0 = inlined_call_operand.hbm [shape: f32[16,16], index: 0, kind: input, shape index: {}]   ;;  %s446_s1 = inlined_call_operand.hbm [shape: f32[16,32], index: 1, kind: input, shape index: {}]   ;;  %s447_s2 = inlined_call_operand.vmem [shape: f32[1,32], index: 2, kind: input, shape index: {}]   ;;  %s448_s3 = inlined_call_operand.vmem [shape: f32[1,32], index: 3, kind: input, shape index: {}]   ;;  %s449_s4 = inlined_call_operand.<no memory space> [shape: f32[1,1], index: 4, kind: input, shape index: {}]   ;;  %s450_s5 = inlined_call_operand.hbm [shape: f32[1,1,128], index: 5, kind: output, shape index: {}]  }
   0x1   :  { %v10_v0 = vstv %s449_s4 }
   0x2   :  { %11 = vst [vmem:[#allocation2] sm:$0x1] %v10_v0 }
   0x3   :  { %12 = vsyncpa [#allocation4], 0 }
   0x4   :  { %13 = vsyncpa [#allocation7], 0 }
   0x5   :  { %14 = vsyncpa [#allocation5], 0 }
   0x6   :  { %18 = vsyncadd [#allocation4], 1792  ;;  %s19_s22 = sshll.u32 %s445_s0, 4  ;;  %s353_s23 = smov [#allocation3]   ;;  %s20_s22 = int_to_ptr.hbm [resolvable:$true] %s19_s22 }
   0x7   :  { %s21_s24 = sshll.u32 %s353_s23, 4  ;;  %s32_s27 = sshll.u32 %s446_s1, 4  ;;  %s22_s24 = int_to_ptr.vmem [resolvable:$true] %s21_s24  ;;  %s33_s27 = int_to_ptr.hbm [resolvable:$true] %s32_s27 }
   0x8   :  { %s354_s28 = smov 128   ;;  %s355_s29 = smov 8  }
   0x9   :  { %27 = dma.hbm_to_vmem [thread:$0]  %s20_s22, 256, %s22_s24, [#allocation4], %s354_s28, %s354_s28, %s355_s29  }
   0xa   :  { %s356_s4 = smov [#allocation6]  }
   0xb   :  { %s34_s30 = sshll.u32 %s356_s4, 4  ;;  %s35_s30 = int_to_ptr.vmem [resolvable:$true] %s34_s30 }
   0xc   :  { %40 = dma.hbm_to_vmem [thread:$0]  %s33_s27, 256, %s35_s30, [#allocation7], %s354_s28, %s354_s28, %s355_s29  }
   0xd   :  { %347 = dma.done.wait [#allocation4], 2048  }
   0xe   :  { %348 = vsyncadd [#allocation4], 4294965248 }
   0xf   :  { %349 = dma.done.wait [#allocation7], 256  }
  0x10   :  { %350 = vsyncadd [#allocation7], 4294967040  ;;  %v72_v1 = vld [vmem:[#allocation6] sm:$0xff]  ;;  %v73_v2 = vld [vmem:[#allocation6 + $0x8] sm:$0xff]  ;;  %vm87_vm0 = vcmask 130048   ;;  %vm194_vm1 = vcmask 261120  }
  0x11   :  { %v64_v3 = vld [vmem:[#allocation3 + $0x40] sm:$0xff]  ;;  %v74_v4 = vpack.c.bf16 %v73_v2, %v72_v1  ;;  %v65_v5 = vld [vmem:[#allocation3 + $0x48] sm:$0xff]  ;;  %v66_v10 = vld [vmem:[#allocation3 + $0x50] sm:$0xff]  ;;  %s358_s7 = smov [#allocation8]   ;;  %s244_s11 = sshll.u32 %s450_s5, 4  ;;  %s245_s11 = int_to_ptr.hbm [resolvable:$true] %s244_s11 }
  0x12   :  { %v80_v6 = vpack.c.bf16 %v65_v5, %v64_v3  ;;  %v56_v7 = vld [vmem:[#allocation3] sm:$0xff]  ;;  %v57_v8 = vld [vmem:[#allocation3 + $0x8] sm:$0xff]  ;;  %v67_v11 = vld [vmem:[#allocation3 + $0x58] sm:$0xff]  ;;  %s242_s8 = sshll.u32 %s358_s7, 4  ;;  %s243_s8 = int_to_ptr.vmem [resolvable:$true] %s242_s8 }
  0x13   :  { %264 = vmatpush.bf16.msra.mxu2 %v74_v4  ;;  %119 = vmatpush.bf16.msra.mxu0 %v74_v4  ;;  %v76_v9 = vpack.c.bf16 %v57_v8, %v56_v7  ;;  %v58_v12 = vld [vmem:[#allocation3 + $0x10] sm:$0xff]  ;;  %v59_v13 = vld [vmem:[#allocation3 + $0x18] sm:$0xff]  ;;  %v81_v14 = vpack.c.bf16 %v67_v11, %v66_v10  ;;  %v68_v16 = vld [vmem:[#allocation3 + $0x60] sm:$0xff] }
  0x14   :  { %v77_v15 = vpack.c.bf16 %v59_v13, %v58_v12  ;;  %v69_v17 = vld [vmem:[#allocation3 + $0x68] sm:$0xff]  ;;  %v60_v18 = vld [vmem:[#allocation3 + $0x20] sm:$0xff]  ;;  %v70_v22 = vld [vmem:[#allocation3 + $0x70] sm:$0xff] }
  0x15   :  { %v61_v19 = vld [vmem:[#allocation3 + $0x28] sm:$0xff]  ;;  %v82_v20 = vpack.c.bf16 %v69_v17, %v68_v16  ;;  %v71_v23 = vld [vmem:[#allocation3 + $0x78] sm:$0xff]  ;;  %v62_v24 = vld [vmem:[#allocation3 + $0x30] sm:$0xff] }
  0x16   :  { %259 = vmatmul.msk.bf16.vlgmr.msra.gmra.mxu2 %vm87_vm0, %v80_v6  ;;  %255 = vmatmul.msk.bf16.vlgmr.msra.gmra.mxu0 %vm87_vm0, %v76_v9  ;;  %v78_v21 = vpack.c.bf16 %v61_v19, %v60_v18  ;;  %v63_v25 = vld [vmem:[#allocation3 + $0x38] sm:$0xff]  ;;  %v83_v26 = vpack.c.bf16 %v71_v23, %v70_v22 }
  0x17   :  { %v79_v27 = vpack.c.bf16 %v63_v25, %v62_v24  ;;  %v409_v29 = vld [vmem:[%s447_s2] ss:$0 sm:$0xff] }
  0x26   :  { %260 = vmatmul.msk.bf16.gmra.mxu2 %vm87_vm0, %v81_v14  ;;  %256 = vmatmul.msk.bf16.gmra.mxu0 %vm87_vm0, %v77_v15 }
  0x36   :  { %261 = vmatmul.msk.bf16.gmra.mxu2 %vm87_vm0, %v82_v20  ;;  %257 = vmatmul.msk.bf16.gmra.mxu0 %vm87_vm0, %v78_v21  ;;  %v179_v20 = vld [vmem:[#allocation2] sm:$0x1]  ;;  %v357_v21 = vmov 0  }
  0x37   :  { %271 = vset.pattern.permute.xlu0 %v357_v21 }
  0x38   :  { %190 = vperm.xlu0 %271, %v179_v20  }
  0x46   :  { %262 = vmatmul.msk.bf16.gmra.mxu2 %vm87_vm0, %v83_v26  ;;  %258 = vmatmul.msk.bf16.gmra.mxu0 %vm87_vm0, %v79_v27 }
  0x93   :  { %v121_v28 = vpop.f32.mrf.mxu0 }
  0x94   :  { %v122_v30 = vadd.f32 %v409_v29, %v121_v28 }
  0x96   :  { %v161_v33 = vmax.f32 %v122_v30, 0.0 }
  0x99   :  { %v141_v31 = vpop.f32.mrf.mxu2 }
  0x9a   :  { %v142_v36 = vadd.f32 %v409_v29, %v141_v31 }
  0x9b   :  { %v123_v32 = vpop.f32.mrf.mxu0 }
  0x9c   :  { %v124_v34 = vadd.f32 %v409_v29, %v123_v32  ;;  %v169_v40 = vmax.f32 %v142_v36, 0.0  ;;  %v177_v32 = vld [vmem:[%s448_s3] sm:$0x1] }
  0x9e   :  { %v162_v35 = vmax.f32 %v124_v34, 0.0 }
  0xa0   :  { %v414_v37 = vpack.c.bf16 %v162_v35, %v161_v33  ;;  %v178_v33 = vpack.c.bf16 %v177_v32, %v177_v32 }
  0xa1   :  { %v143_v38 = vpop.f32.mrf.mxu2 }
  0xa2   :  { %v144_v39 = vadd.f32 %v409_v29, %v143_v38  ;;  %v199_v31 = vsel %vm194_vm1, %v414_v37, 0 }
  0xa3   :  { %v126_v45 = vpop.f32.mrf.mxu0 }
  0xa4   :  { %v170_v41 = vmax.f32 %v144_v39, 0.0  ;;  %v127_v22 = vadd.f32 %v409_v29, %v126_v45 }
  0xa6   :  { %v184_v42 = vpack.c.bf16 %v170_v41, %v169_v40  ;;  %v163_v25 = vmax.f32 %v127_v22, 0.0 }
  0xa8   :  { %v211_v13 = vsel %vm194_vm1, %v184_v42, 0 }
  0xa9   :  { %v146_v43 = vpop.f32.mrf.mxu2 }
  0xaa   :  { %v147_v1 = vadd.f32 %v409_v29, %v146_v43 }
  0xab   :  { %v128_v48 = vpop.f32.mrf.mxu0 }
  0xac   :  { %v171_v5 = vmax.f32 %v147_v1, 0.0  ;;  %v129_v23 = vadd.f32 %v409_v29, %v128_v48 }
  0xae   :  { %v164_v26 = vmax.f32 %v129_v23, 0.0 }
  0xb0   :  { %v181_v28 = vpack.c.bf16 %v164_v26, %v163_v25 }
  0xb1   :  { %v148_v44 = vpop.f32.mrf.mxu2 }
  0xb2   :  { %v149_v63 = vadd.f32 %v409_v29, %v148_v44  ;;  %v202_v30 = vsel %vm194_vm1, %v181_v28, 0 }
  0xb3   :  { %v131_v50 = vpop.f32.mrf.mxu0 }
  0xb4   :  { %v172_v3 = vmax.f32 %v149_v63, 0.0  ;;  %v132_v14 = vadd.f32 %v409_v29, %v131_v50 }
  0xb6   :  { %v185_v6 = vpack.c.bf16 %v172_v3, %v171_v5  ;;  %v165_v17 = vmax.f32 %v132_v14, 0.0 }
  0xb8   :  { %v214_v7 = vsel %vm194_vm1, %v185_v6, 0 }
  0xb9   :  { %v151_v46 = vpop.f32.mrf.mxu2 }
  0xba   :  { %v152_v58 = vadd.f32 %v409_v29, %v151_v46 }
  0xbb   :  { %v133_v57 = vpop.f32.mrf.mxu0 }
  0xbc   :  { %v173_v62 = vmax.f32 %v152_v58, 0.0  ;;  %v134_v15 = vadd.f32 %v409_v29, %v133_v57 }
  0xbe   :  { %v166_v18 = vmax.f32 %v134_v15, 0.0 }
  0xc0   :  { %v182_v24 = vpack.c.bf16 %v166_v18, %v165_v17 }
  0xc1   :  { %v153_v47 = vpop.f32.mrf.mxu2 }
  0xc2   :  { %v154_v54 = vadd.f32 %v409_v29, %v153_v47  ;;  %v205_v27 = vsel %vm194_vm1, %v182_v24, 0 }
  0xc3   :  { %v136_v2 = vpop.f32.mrf.mxu0 }
  0xc4   :  { %v174_v60 = vmax.f32 %v154_v54, 0.0  ;;  %v137_v9 = vadd.f32 %v409_v29, %v136_v2 }
  0xc6   :  { %v186_v0 = vpack.c.bf16 %v174_v60, %v173_v62  ;;  %v167_v11 = vmax.f32 %v137_v9, 0.0 }
  0xc8   :  { %v217_v4 = vsel %vm194_vm1, %v186_v0, 0 }
  0xc9   :  { %v156_v49 = vpop.f32.mrf.mxu2 }
  0xca   :  { %v157_v51 = vadd.f32 %v409_v29, %v156_v49 }
  0xcb   :  { %v138_v8 = vpop.f32.mrf.mxu0 }
  0xcc   :  { %v175_v55 = vmax.f32 %v157_v51, 0.0  ;;  %v139_v10 = vadd.f32 %v409_v29, %v138_v8 }
  0xce   :  { %v168_v12 = vmax.f32 %v139_v10, 0.0 }
  0xd0   :  { %v183_v16 = vpack.c.bf16 %v168_v12, %v167_v11 }
  0xd1   :  { %v158_v52 = vpop.f32.mrf.mxu2 }
  0xd2   :  { %v159_v53 = vadd.f32 %v409_v29, %v158_v52  ;;  %v208_v19 = vsel %vm194_vm1, %v183_v16, 0  ;;  %v191_v29 = vpop.permute.xlu0 %190 }
  0xd3   :  { %v193_v34 = vperm.slane %v191_v29, 0 }
  0xd4   :  { %v176_v56 = vmax.f32 %v159_v53, 0.0 }
  0xd6   :  { %v187_v59 = vpack.c.bf16 %v176_v56, %v175_v55 }
  0xd8   :  { %v220_v61 = vsel %vm194_vm1, %v187_v59, 0 }
  0xd9   :  { %222 = vmatpush.bf16.xpose.msra.mxu1 %v220_v61 }
  0xe1   :  { %223 = vmatpush.bf16.xpose.msra.mxu1 %v217_v4 }
  0xe9   :  { %224 = vmatpush.bf16.xpose.msra.mxu1 %v214_v7 }
  0xf1   :  { %225 = vmatpush.bf16.xpose.msra.mxu1 %v211_v13 }
  0xf9   :  { %226 = vmatpush.bf16.xpose.msra.mxu1 %v208_v19 }
 0x101   :  { %227 = vmatpush.bf16.xpose.msra.mxu1 %v205_v27 }
 0x109   :  { %228 = vmatpush.bf16.xpose.msra.mxu1 %v202_v30 }
 0x111   :  { %229 = vmatpush.bf16.xpose.msra.mxu1 %v199_v31 }
 0x118   :  { %263 = vmatmul.msk.bf16.vlgmr.msra.gmra.mxu1 %vm194_vm1, %v178_v33 }
 0x195   :  { %v231_v35 = vpop.f32.mrf.mxu1 }
 0x196   :  { %v232_v36 = vadd.f32 %v231_v35, %v193_v34 }
 0x198   :  { %273 = vtanh.f32 %v232_v36 }
 0x19d   :  { %v233_v37 = vpop.f32.mrf.mxu1 }
 0x19e   :  { %v274_v38 = vpop.eup %273 }
 0x19f   :  { %236 = vst [vmem:[#allocation8] sm:$0x1] %v274_v38 }
 0x1a0   :  { %247 = dma.vmem_to_hbm [thread:$0]  %s243_s8, 16, %s245_s11, [#allocation5]  }
 0x1a1   :  { %351 = dma.done.wait [#allocation5], 16  }
 0x1a2   :  { %352 = vsyncadd [#allocation5], 4294967280 }
 0x1a3   :  { %252 = vsyncpa [#allocation4], 1 }
 0x1a4   :  { %253 = vsyncpa [#allocation7], 1 }
 0x1a5   :  { %254 = vsyncpa [#allocation5], 1 }

</bundles_post_ra>
